<compile_context>
chip_gen: v7x
topology: tpu7x:2x2x1
jax: 0.10.0
libtpu: 0.0.40
codegen_flags: <defaults>
</compile_context>

<pallas_src>
import functools

import jax
import jax.numpy as jnp
import numpy as np
from jax.experimental import pallas as pl
from jax.experimental.pallas import tpu as pltpu


# ----------------------------------------------------------------------------
# Fused Pallas kernel: x-net (convs + linears) + conditional actnorm + logdet
# ----------------------------------------------------------------------------
def _fused_cond_actnorm_kernel(
    ld_ref,                       # SMEM (1,1)  scalar input logdet
    p1_ref,                       # (B*h1*w1, C_x*4)   space-to-depth'd x
    y_ref,                        # (B, Cy*Hy*Wy)      lane-dense y
    w1_ref, b1_ref,               # conv1: (C_x*4, Ch), (1, Ch)
    s2_ref, w2_ref, b2_ref,       # conv2: (4, M2, M1), (4, Ch, Ch), (1, Ch)
    s3_ref, w3_ref, b3_ref,       # conv3: (4, M3, M2), (4, Ch, Ch), (1, Ch)
    r_ref, wl1_ref, bl1_ref,      # flatten+linear1: (nsp, B, B*nsp), (nsp, Ch, Hd), (1, Hd)
    wl2_ref, bl2_ref,             # linear2: (Hd, Hd), (1, Hd)
    wl3_ref, bl3_ref,             # linear3: (Hd, 2*Cy), (1, 2*Cy)
    elog_ref, ebias_ref,          # (2*Cy, Cy*Hy*Wy) 0/1 expansion matrices
    yo_ref, ldo_ref,              # outputs: (B, Cy*Hy*Wy) VMEM, (B, 1) VMEM
    *, reverse):
    dot = lambda a, b: jnp.dot(a, b, preferred_element_type=jnp.float32)

    # conv stage 1: patch matmul (patches pre-extracted in the wrapper)
    h = jnp.maximum(dot(p1_ref[...], w1_ref[...]) + b1_ref[...], 0.0)

    # conv stages 2 and 3: the k=2 / s=2 conv is a sum over the 4 kernel taps
    # of (row-selection matmul) @ (per-tap channel-mixing weight).  The 0/1
    # selection matrices implement space-to-depth without any in-kernel
    # reshape/transpose (so no Mosaic relayouts).
    def conv_stage(h_prev, s_ref, w_ref, b_ref):
        acc = dot(dot(s_ref[0], h_prev), w_ref[0])
        for k in range(1, 4):
            acc = acc + dot(dot(s_ref[k], h_prev), w_ref[k])
        return jnp.maximum(acc + b_ref[...], 0.0)

    h = conv_stage(h, s2_ref, w2_ref, b2_ref)        # (B*h2*w2, Ch)
    h = conv_stage(h, s3_ref, w3_ref, b3_ref)        # (B*h3*w3, Ch)

    # torch-style channel-major flatten fused with Linear1 via row selectors
    nsp = r_ref.shape[0]
    acc = dot(dot(r_ref[0], h), wl1_ref[0])
    for s in range(1, nsp):
        acc = acc + dot(dot(r_ref[s], h), wl1_ref[s])
    h = jnp.maximum(acc + bl1_ref[...], 0.0)         # (B, hidden)

    h = jnp.maximum(dot(h, wl2_ref[...]) + bl2_ref[...], 0.0)   # (B, hidden)
    h = jnp.tanh(dot(h, wl3_ref[...]) + bl3_ref[...])           # (B, 2*Cy)

    # split_feature + broadcast each channel's logs/bias over Hy*Wy pixels,
    # done as matmuls against constant 0/1 expansion matrices -> lane-dense.
    logs = dot(h, elog_ref[...])                     # (B, Cy*Hy*Wy)
    bias = dot(h, ebias_ref[...])                    # (B, Cy*Hy*Wy)

    # each channel's log appears exactly Hy*Wy times in `logs`, so the lane
    # sum equals dims * sum_c(logs_c).
    dl = jnp.sum(logs, axis=1, keepdims=True)        # (B, 1)
    ld0 = ld_ref[0, 0]

    y = y_ref[...]
    if not reverse:
        yo_ref[...] = (y + bias) * jnp.exp(logs)
        ldo_ref[...] = ld0 + dl
    else:
        yo_ref[...] = y * jnp.exp(-logs) - bias
        ldo_ref[...] = ld0 - dl


# ----------------------------------------------------------------------------
# One-time parameter preparation (hoisted out of the forward path)
# ----------------------------------------------------------------------------
def _space_to_depth2(x):
    """(B,C,H,W) -> (B*(H/2)*(W/2), C*4); patch column order = (c, kh, kw)."""
    B, C, H, W = x.shape
    x = x.reshape(B, C, H // 2, 2, W // 2, 2)
    x = x.transpose(0, 2, 4, 1, 3, 5)            # (B, H/2, W/2, C, 2, 2)
    return x.reshape(B * (H // 2) * (W // 2), C * 4)


def _sel_matrices(B, h_in, w_in):
    """(4, B*h_out*w_out, B*h_in*w_in) 0/1 matrices; k = kh*2 + kw."""
    h_out, w_out = h_in // 2, w_in // 2
    M2, M1 = B * h_out * w_out, B * h_in * w_in
    rows = np.arange(M2)
    b = rows // (h_out * w_out)
    rem = rows % (h_out * w_out)
    i2, j2 = rem // w_out, rem % w_out
    mats = []
    for di in range(2):
        for dj in range(2):
            src = b * h_in * w_in + (2 * i2 + di) * w_in + (2 * j2 + dj)
            m = np.zeros((M2, M1), np.float32)
            m[rows, src] = 1.0
            mats.append(m)
    return jnp.asarray(np.stack(mats))


def prepare_params(params, B, x_size, y_size):
    """Reshape weights and build constant selection/expansion matrices once.

    NOTE: the selection matrices fold the batch dimension into rows, so the
    prepared params are specific to this batch size B.
    """
    C_x, H_x, W_x = x_size
    Cy, Hy, Wy = y_size
    (w1, b1), (w2, b2), (w3, b3) = params["convs"]
    (l1w, l1b), (l2w, l2b), (l3w, l3b) = params["linears"]
    Ch = int(w1.shape[0])                         # x_hidden_channels
    f32 = lambda a: jnp.asarray(a, jnp.float32)

    # conv1 as patch matmul; patch columns are (c, kh, kw) ordered.
    W1m = f32(w1).reshape(Ch, C_x * 4).T          # (C_x*4, Ch)
    b1m = f32(b1).reshape(1, Ch)

    def conv_tap_weights(w):                      # (4, Cin, Cout), k = kh*2+kw
        return jnp.stack([jnp.transpose(f32(w)[:, :, di, dj])
                          for di in range(2) for dj in range(2)])

    W2k, b2m = conv_tap_weights(w2), f32(b2).reshape(1, Ch)
    W3k, b3m = conv_tap_weights(w3), f32(b3).reshape(1, Ch)

    S2 = _sel_matrices(B, H_x // 2, W_x // 2)     # (4, B*H/4*W/4, B*H/2*W/2)
    S3 = _sel_matrices(B, H_x // 4, W_x // 4)     # (4, B*H/8*W/8, B*H/4*W/4)

    # torch .view(B,-1) flatten of (B, Ch, H/8, W/8) has index c*nsp + s.
    nsp = (H_x // 8) * (W_x // 8)
    R = np.zeros((nsp, B, B * nsp), np.float32)
    for s in range(nsp):
        for b in range(B):
            R[s, b, b * nsp + s] = 1.0
    R = jnp.asarray(R)
    WL1 = jnp.stack([f32(l1w)[s::nsp, :] for s in range(nsp)])  # (nsp, Ch, Hd)
    bl1 = f32(l1b).reshape(1, -1)
    WL2, bl2 = f32(l2w), f32(l2b).reshape(1, -1)
    WL3, bl3 = f32(l3w), f32(l3b).reshape(1, -1)

    # logs/bias channel -> pixel broadcast matrices (split_feature folded in).
    HW = Hy * Wy
    Elog = np.zeros((2 * Cy, Cy * HW), np.float32)
    Ebias = np.zeros((2 * Cy, Cy * HW), np.float32)
    for c in range(Cy):
        Elog[c, c * HW:(c + 1) * HW] = 1.0
        Ebias[Cy + c, c * HW:(c + 1) * HW] = 1.0
    Elog, Ebias = jnp.asarray(Elog), jnp.asarray(Ebias)

    return (W1m, b1m, S2, W2k, b2m, S3, W3k, b3m,
            R, WL1, bl1, WL2, bl2, WL3, bl3, Elog, Ebias)


# ----------------------------------------------------------------------------
# Forward wrapper: single pallas_call
# ----------------------------------------------------------------------------
@functools.partial(jax.jit, static_argnames=("reverse",))
def cond_actnorm_forward(prep, x, y, logdet=0.0, reverse=False):
    B = x.shape[0]
    _, Cy, Hy, Wy = y.shape

    patches1 = _space_to_depth2(x.astype(jnp.float32))        # (B*h1*w1, C_x*4)
    y2 = y.astype(jnp.float32).reshape(B, Cy * Hy * Wy)       # pure view
    ld_in = jnp.full((1, 1), logdet, jnp.float32)

    vmem = pl.BlockSpec(memory_space=pltpu.MemorySpace.VMEM)
    smem = pl.BlockSpec(memory_space=pltpu.MemorySpace.SMEM)

    y_out, ld_out = pl.pallas_call(
        functools.partial(_fused_cond_actnorm_kernel, reverse=reverse),
        out_shape=(jax.ShapeDtypeStruct((B, Cy * Hy * Wy), jnp.float32),
                   jax.ShapeDtypeStruct((B, 1), jnp.float32)),
        in_specs=[smem] + [vmem] * 19,
        out_specs=(vmem, vmem),
    )(ld_in, patches1, y2, *prep)

    return y_out.reshape(B, Cy, Hy, Wy), ld_out.reshape(B)


# ----------------------------------------------------------------------------
# Deterministic synthetic parameters (shapes from CondActNorm.__init__).
# NOTE: the PyTorch module zero-inits conv/linear weights; we use small
# deterministic random values so the kernels compute something non-trivial.
# ----------------------------------------------------------------------------
def init_params(key, x_size, y_channels, x_hidden_channels, x_hidden_size):
    C_x, H_x, W_x = x_size
    keys = jax.random.split(key, 12)
    s = 0.1

    conv_in = [C_x, x_hidden_channels, x_hidden_channels]
    convs = []
    for i, cin in enumerate(conv_in):
        w = s * jax.random.normal(keys[2 * i], (x_hidden_channels, cin, 2, 2), jnp.float32)
        b = s * jax.random.normal(keys[2 * i + 1], (x_hidden_channels,), jnp.float32)
        convs.append((w, b))

    lin_dims = [(x_hidden_channels * H_x * W_x // 64, x_hidden_size),
                (x_hidden_size, x_hidden_size),
                (x_hidden_size, 2 * y_channels)]
    linears = []
    for i, (din, dout) in enumerate(lin_dims):
        w = s * jax.random.normal(keys[6 + 2 * i], (din, dout), jnp.float32)  # (in, out)
        b = s * jax.random.normal(keys[7 + 2 * i], (dout,), jnp.float32)
        linears.append((w, b))

    return {"convs": convs, "linears": linears}


# ----------------------------------------------------------------------------
# Pure-JAX reference (for correctness check)
# ----------------------------------------------------------------------------
def reference_forward(params, x, y, logdet=0.0, reverse=False):
    h = x
    for (w, b) in params["convs"]:
        h = jax.lax.conv_general_dilated(
            h, w, window_strides=(2, 2), padding="VALID",
            dimension_numbers=("NCHW", "OIHW", "NCHW"))
        h = jax.nn.relu(h + b.reshape(1, -1, 1, 1))
    B = x.shape[0]
    h = h.reshape(B, -1)
    (w1, b1), (w2, b2), (w3, b3) = params["linears"]
    h = jax.nn.relu(h @ w1 + b1)
    h = jax.nn.relu(h @ w2 + b2)
    h = jnp.tanh(h @ w3 + b3)
    C2 = h.shape[1]
    logs = h[:, : C2 // 2].reshape(B, -1, 1, 1)
    bias = h[:, C2 // 2:].reshape(B, -1, 1, 1)
    dims = y.shape[2] * y.shape[3]
    if not reverse:
        yo = (y + bias) * jnp.exp(logs)
        dl = dims * jnp.sum(logs, axis=(1, 2, 3))
    else:
        yo = y * jnp.exp(-logs) - bias
        dl = -dims * jnp.sum(logs, axis=(1, 2, 3))
    return yo, logdet + dl


if __name__ == "__main__":
    key = jax.random.PRNGKey(0)
    kp, kx, ky = jax.random.split(key, 3)

    B = 2
    x_size = (4, 16, 16)           # (C_x, H_x, W_x)
    y_channels = 4
    x_hidden_channels = 8
    x_hidden_size = 32
    Hy = Wy = 8

    params = init_params(kp, x_size, y_channels, x_hidden_channels, x_hidden_size)
    prep = prepare_params(params, B, x_size, (y_channels, Hy, Wy))
    x = jax.random.normal(kx, (B,) + x_size, jnp.float32)
    y = jax.random.normal(ky, (B, y_channels, Hy, Wy), jnp.float32)

    # forward
    y_out, logdet_out = cond_actnorm_forward(prep, x, y, logdet=0.0, reverse=False)
    jax.block_until_ready((y_out, logdet_out))

    y_ref, logdet_ref = reference_forward(params, x, y, logdet=0.0, reverse=False)
    assert jnp.allclose(y_out, y_ref, atol=1e-5, rtol=1e-5), "y mismatch"
    assert jnp.allclose(logdet_out, logdet_ref, atol=1e-4, rtol=1e-4), "logdet mismatch"

    # reverse path: same conditioning x, invert y_out back to y
    y_rev, logdet_rev = cond_actnorm_forward(prep, x, y_out, logdet=0.0, reverse=True)
    jax.block_until_ready((y_rev, logdet_rev))

    y_rev_ref, logdet_rev_ref = reference_forward(params, x, y_out, logdet=0.0, reverse=True)
    assert jnp.allclose(y_rev, y_rev_ref, atol=1e-5, rtol=1e-5), "reverse y mismatch"
    assert jnp.allclose(logdet_rev, logdet_rev_ref, atol=1e-4, rtol=1e-4), "reverse logdet mismatch"
    assert jnp.allclose(y_rev, y, atol=1e-4, rtol=1e-4), "round-trip mismatch"

    print("KERNEL_OK")
</pallas_src>

<mosaic_0001>
module attributes {stable_mosaic.version = 11 : i64} {
  func.func @_fused_cond_actnorm_kernel(%arg0: memref<1x1xf32, #tpu.memory_space<smem>>, %arg1: memref<128x16xf32, #tpu.memory_space<vmem>>, %arg2: memref<2x256xf32, #tpu.memory_space<vmem>>, %arg3: memref<16x8xf32, #tpu.memory_space<vmem>>, %arg4: memref<1x8xf32, #tpu.memory_space<vmem>>, %arg5: memref<4x32x128xf32, #tpu.memory_space<vmem>>, %arg6: memref<4x8x8xf32, #tpu.memory_space<vmem>>, %arg7: memref<1x8xf32, #tpu.memory_space<vmem>>, %arg8: memref<4x8x32xf32, #tpu.memory_space<vmem>>, %arg9: memref<4x8x8xf32, #tpu.memory_space<vmem>>, %arg10: memref<1x8xf32, #tpu.memory_space<vmem>>, %arg11: memref<4x2x8xf32, #tpu.memory_space<vmem>>, %arg12: memref<4x8x32xf32, #tpu.memory_space<vmem>>, %arg13: memref<1x32xf32, #tpu.memory_space<vmem>>, %arg14: memref<32x32xf32, #tpu.memory_space<vmem>>, %arg15: memref<1x32xf32, #tpu.memory_space<vmem>>, %arg16: memref<32x8xf32, #tpu.memory_space<vmem>>, %arg17: memref<1x8xf32, #tpu.memory_space<vmem>>, %arg18: memref<8x256xf32, #tpu.memory_space<vmem>>, %arg19: memref<8x256xf32, #tpu.memory_space<vmem>>, %arg20: memref<2x256xf32, #tpu.memory_space<vmem>>, %arg21: memref<2x1xf32, #tpu.memory_space<vmem>>) attributes {dimension_semantics = [], scalar_prefetch = 0 : i64, scratch_operands = 0 : i64, tpu.core_type = #tpu.core_type<tc>} {
    %c0 = arith.constant 0 : index
    %c0_0 = arith.constant 0 : index
    %0 = vector.load %arg1[%c0, %c0_0] : memref<128x16xf32, #tpu.memory_space<vmem>>, vector<128x16xf32>
    %c0_1 = arith.constant 0 : index
    %c0_2 = arith.constant 0 : index
    %1 = vector.load %arg3[%c0_1, %c0_2] : memref<16x8xf32, #tpu.memory_space<vmem>>, vector<16x8xf32>
    %cst = arith.constant dense<0.000000e+00> : vector<128x8xf32>
    %2 = tpu.matmul %0, %1, %cst {dimension_numbers = #tpu.dot_dimension_numbers<[1], [0], [0], [1], [0, 0, 1, 1], [], []>} : vector<128x16xf32>, vector<16x8xf32>, vector<128x8xf32> -> vector<128x8xf32>
    %c0_3 = arith.constant 0 : index
    %c0_4 = arith.constant 0 : index
    %3 = vector.load %arg4[%c0_3, %c0_4] : memref<1x8xf32, #tpu.memory_space<vmem>>, vector<1x8xf32>
    %4 = vector.broadcast %3 : vector<1x8xf32> to vector<128x8xf32>
    %5 = arith.addf %2, %4 : vector<128x8xf32>
    %cst_5 = arith.constant 0.000000e+00 : f32
    %6 = vector.broadcast %cst_5 : f32 to vector<128x8xf32>
    %7 = arith.maximumf %5, %6 : vector<128x8xf32>
    %c0_6 = arith.constant 0 : index
    %c0_7 = arith.constant 0 : index
    %c0_8 = arith.constant 0 : index
    %8 = vector.load %arg5[%c0_6, %c0_7, %c0_8] : memref<4x32x128xf32, #tpu.memory_space<vmem>>, vector<1x32x128xf32>
    %9 = vector.shape_cast %8 : vector<1x32x128xf32> to vector<32x128xf32>
    %cst_9 = arith.constant dense<0.000000e+00> : vector<32x8xf32>
    %10 = tpu.matmul %9, %7, %cst_9 {dimension_numbers = #tpu.dot_dimension_numbers<[1], [0], [0], [1], [0, 0, 1, 1], [], []>} : vector<32x128xf32>, vector<128x8xf32>, vector<32x8xf32> -> vector<32x8xf32>
    %c0_10 = arith.constant 0 : index
    %c0_11 = arith.constant 0 : index
    %c0_12 = arith.constant 0 : index
    %11 = vector.load %arg6[%c0_10, %c0_11, %c0_12] : memref<4x8x8xf32, #tpu.memory_space<vmem>>, vector<1x8x8xf32>
    %12 = vector.shape_cast %11 : vector<1x8x8xf32> to vector<8x8xf32>
    %cst_13 = arith.constant dense<0.000000e+00> : vector<32x8xf32>
    %13 = tpu.matmul %10, %12, %cst_13 {dimension_numbers = #tpu.dot_dimension_numbers<[1], [0], [0], [1], [0, 0, 1, 1], [], []>} : vector<32x8xf32>, vector<8x8xf32>, vector<32x8xf32> -> vector<32x8xf32>
    %c1 = arith.constant 1 : index
    %c0_14 = arith.constant 0 : index
    %c0_15 = arith.constant 0 : index
    %14 = vector.load %arg5[%c1, %c0_14, %c0_15] : memref<4x32x128xf32, #tpu.memory_space<vmem>>, vector<1x32x128xf32>
    %15 = vector.shape_cast %14 : vector<1x32x128xf32> to vector<32x128xf32>
    %cst_16 = arith.constant dense<0.000000e+00> : vector<32x8xf32>
    %16 = tpu.matmul %15, %7, %cst_16 {dimension_numbers = #tpu.dot_dimension_numbers<[1], [0], [0], [1], [0, 0, 1, 1], [], []>} : vector<32x128xf32>, vector<128x8xf32>, vector<32x8xf32> -> vector<32x8xf32>
    %c1_17 = arith.constant 1 : index
    %c0_18 = arith.constant 0 : index
    %c0_19 = arith.constant 0 : index
    %17 = vector.load %arg6[%c1_17, %c0_18, %c0_19] : memref<4x8x8xf32, #tpu.memory_space<vmem>>, vector<1x8x8xf32>
    %18 = vector.shape_cast %17 : vector<1x8x8xf32> to vector<8x8xf32>
    %cst_20 = arith.constant dense<0.000000e+00> : vector<32x8xf32>
    %19 = tpu.matmul %16, %18, %cst_20 {dimension_numbers = #tpu.dot_dimension_numbers<[1], [0], [0], [1], [0, 0, 1, 1], [], []>} : vector<32x8xf32>, vector<8x8xf32>, vector<32x8xf32> -> vector<32x8xf32>
    %20 = arith.addf %13, %19 : vector<32x8xf32>
    %c2 = arith.constant 2 : index
    %c0_21 = arith.constant 0 : index
    %c0_22 = arith.constant 0 : index
    %21 = vector.load %arg5[%c2, %c0_21, %c0_22] : memref<4x32x128xf32, #tpu.memory_space<vmem>>, vector<1x32x128xf32>
    %22 = vector.shape_cast %21 : vector<1x32x128xf32> to vector<32x128xf32>
    %cst_23 = arith.constant dense<0.000000e+00> : vector<32x8xf32>
    %23 = tpu.matmul %22, %7, %cst_23 {dimension_numbers = #tpu.dot_dimension_numbers<[1], [0], [0], [1], [0, 0, 1, 1], [], []>} : vector<32x128xf32>, vector<128x8xf32>, vector<32x8xf32> -> vector<32x8xf32>
    %c2_24 = arith.constant 2 : index
    %c0_25 = arith.constant 0 : index
    %c0_26 = arith.constant 0 : index
    %24 = vector.load %arg6[%c2_24, %c0_25, %c0_26] : memref<4x8x8xf32, #tpu.memory_space<vmem>>, vector<1x8x8xf32>
    %25 = vector.shape_cast %24 : vector<1x8x8xf32> to vector<8x8xf32>
    %cst_27 = arith.constant dense<0.000000e+00> : vector<32x8xf32>
    %26 = tpu.matmul %23, %25, %cst_27 {dimension_numbers = #tpu.dot_dimension_numbers<[1], [0], [0], [1], [0, 0, 1, 1], [], []>} : vector<32x8xf32>, vector<8x8xf32>, vector<32x8xf32> -> vector<32x8xf32>
    %27 = arith.addf %20, %26 : vector<32x8xf32>
    %c3 = arith.constant 3 : index
    %c0_28 = arith.constant 0 : index
    %c0_29 = arith.constant 0 : index
    %28 = vector.load %arg5[%c3, %c0_28, %c0_29] : memref<4x32x128xf32, #tpu.memory_space<vmem>>, vector<1x32x128xf32>
    %29 = vector.shape_cast %28 : vector<1x32x128xf32> to vector<32x128xf32>
    %cst_30 = arith.constant dense<0.000000e+00> : vector<32x8xf32>
    %30 = tpu.matmul %29, %7, %cst_30 {dimension_numbers = #tpu.dot_dimension_numbers<[1], [0], [0], [1], [0, 0, 1, 1], [], []>} : vector<32x128xf32>, vector<128x8xf32>, vector<32x8xf32> -> vector<32x8xf32>
    %c3_31 = arith.constant 3 : index
    %c0_32 = arith.constant 0 : index
    %c0_33 = arith.constant 0 : index
    %31 = vector.load %arg6[%c3_31, %c0_32, %c0_33] : memref<4x8x8xf32, #tpu.memory_space<vmem>>, vector<1x8x8xf32>
    %32 = vector.shape_cast %31 : vector<1x8x8xf32> to vector<8x8xf32>
    %cst_34 = arith.constant dense<0.000000e+00> : vector<32x8xf32>
    %33 = tpu.matmul %30, %32, %cst_34 {dimension_numbers = #tpu.dot_dimension_numbers<[1], [0], [0], [1], [0, 0, 1, 1], [], []>} : vector<32x8xf32>, vector<8x8xf32>, vector<32x8xf32> -> vector<32x8xf32>
    %34 = arith.addf %27, %33 : vector<32x8xf32>
    %c0_35 = arith.constant 0 : index
    %c0_36 = arith.constant 0 : index
    %35 = vector.load %arg7[%c0_35, %c0_36] : memref<1x8xf32, #tpu.memory_space<vmem>>, vector<1x8xf32>
    %36 = vector.broadcast %35 : vector<1x8xf32> to vector<32x8xf32>
    %37 = arith.addf %34, %36 : vector<32x8xf32>
    %cst_37 = arith.constant 0.000000e+00 : f32
    %38 = vector.broadcast %cst_37 : f32 to vector<32x8xf32>
    %39 = arith.maximumf %37, %38 : vector<32x8xf32>
    %c0_38 = arith.constant 0 : index
    %c0_39 = arith.constant 0 : index
    %c0_40 = arith.constant 0 : index
    %40 = vector.load %arg8[%c0_38, %c0_39, %c0_40] : memref<4x8x32xf32, #tpu.memory_space<vmem>>, vector<1x8x32xf32>
    %41 = vector.shape_cast %40 : vector<1x8x32xf32> to vector<8x32xf32>
    %cst_41 = arith.constant dense<0.000000e+00> : vector<8x8xf32>
    %42 = tpu.matmul %41, %39, %cst_41 {dimension_numbers = #tpu.dot_dimension_numbers<[1], [0], [0], [1], [0, 0, 1, 1], [], []>} : vector<8x32xf32>, vector<32x8xf32>, vector<8x8xf32> -> vector<8x8xf32>
    %c0_42 = arith.constant 0 : index
    %c0_43 = arith.constant 0 : index
    %c0_44 = arith.constant 0 : index
    %43 = vector.load %arg9[%c0_42, %c0_43, %c0_44] : memref<4x8x8xf32, #tpu.memory_space<vmem>>, vector<1x8x8xf32>
    %44 = vector.shape_cast %43 : vector<1x8x8xf32> to vector<8x8xf32>
    %cst_45 = arith.constant dense<0.000000e+00> : vector<8x8xf32>
    %45 = tpu.matmul %42, %44, %cst_45 {dimension_numbers = #tpu.dot_dimension_numbers<[1], [0], [0], [1], [0, 0, 1, 1], [], []>} : vector<8x8xf32>, vector<8x8xf32>, vector<8x8xf32> -> vector<8x8xf32>
    %c1_46 = arith.constant 1 : index
    %c0_47 = arith.constant 0 : index
    %c0_48 = arith.constant 0 : index
    %46 = vector.load %arg8[%c1_46, %c0_47, %c0_48] : memref<4x8x32xf32, #tpu.memory_space<vmem>>, vector<1x8x32xf32>
    %47 = vector.shape_cast %46 : vector<1x8x32xf32> to vector<8x32xf32>
    %cst_49 = arith.constant dense<0.000000e+00> : vector<8x8xf32>
    %48 = tpu.matmul %47, %39, %cst_49 {dimension_numbers = #tpu.dot_dimension_numbers<[1], [0], [0], [1], [0, 0, 1, 1], [], []>} : vector<8x32xf32>, vector<32x8xf32>, vector<8x8xf32> -> vector<8x8xf32>
    %c1_50 = arith.constant 1 : index
    %c0_51 = arith.constant 0 : index
    %c0_52 = arith.constant 0 : index
    %49 = vector.load %arg9[%c1_50, %c0_51, %c0_52] : memref<4x8x8xf32, #tpu.memory_space<vmem>>, vector<1x8x8xf32>
    %50 = vector.shape_cast %49 : vector<1x8x8xf32> to vector<8x8xf32>
    %cst_53 = arith.constant dense<0.000000e+00> : vector<8x8xf32>
    %51 = tpu.matmul %48, %50, %cst_53 {dimension_numbers = #tpu.dot_dimension_numbers<[1], [0], [0], [1], [0, 0, 1, 1], [], []>} : vector<8x8xf32>, vector<8x8xf32>, vector<8x8xf32> -> vector<8x8xf32>
    %52 = arith.addf %45, %51 : vector<8x8xf32>
    %c2_54 = arith.constant 2 : index
    %c0_55 = arith.constant 0 : index
    %c0_56 = arith.constant 0 : index
    %53 = vector.load %arg8[%c2_54, %c0_55, %c0_56] : memref<4x8x32xf32, #tpu.memory_space<vmem>>, vector<1x8x32xf32>
    %54 = vector.shape_cast %53 : vector<1x8x32xf32> to vector<8x32xf32>
    %cst_57 = arith.constant dense<0.000000e+00> : vector<8x8xf32>
    %55 = tpu.matmul %54, %39, %cst_57 {dimension_numbers = #tpu.dot_dimension_numbers<[1], [0], [0], [1], [0, 0, 1, 1], [], []>} : vector<8x32xf32>, vector<32x8xf32>, vector<8x8xf32> -> vector<8x8xf32>
    %c2_58 = arith.constant 2 : index
    %c0_59 = arith.constant 0 : index
    %c0_60 = arith.constant 0 : index
    %56 = vector.load %arg9[%c2_58, %c0_59, %c0_60] : memref<4x8x8xf32, #tpu.memory_space<vmem>>, vector<1x8x8xf32>
    %57 = vector.shape_cast %56 : vector<1x8x8xf32> to vector<8x8xf32>
    %cst_61 = arith.constant dense<0.000000e+00> : vector<8x8xf32>
    %58 = tpu.matmul %55, %57, %cst_61 {dimension_numbers = #tpu.dot_dimension_numbers<[1], [0], [0], [1], [0, 0, 1, 1], [], []>} : vector<8x8xf32>, vector<8x8xf32>, vector<8x8xf32> -> vector<8x8xf32>
    %59 = arith.addf %52, %58 : vector<8x8xf32>
    %c3_62 = arith.constant 3 : index
    %c0_63 = arith.constant 0 : index
    %c0_64 = arith.constant 0 : index
    %60 = vector.load %arg8[%c3_62, %c0_63, %c0_64] : memref<4x8x32xf32, #tpu.memory_space<vmem>>, vector<1x8x32xf32>
    %61 = vector.shape_cast %60 : vector<1x8x32xf32> to vector<8x32xf32>
    %cst_65 = arith.constant dense<0.000000e+00> : vector<8x8xf32>
    %62 = tpu.matmul %61, %39, %cst_65 {dimension_numbers = #tpu.dot_dimension_numbers<[1], [0], [0], [1], [0, 0, 1, 1], [], []>} : vector<8x32xf32>, vector<32x8xf32>, vector<8x8xf32> -> vector<8x8xf32>
    %c3_66 = arith.constant 3 : index
    %c0_67 = arith.constant 0 : index
    %c0_68 = arith.constant 0 : index
    %63 = vector.load %arg9[%c3_66, %c0_67, %c0_68] : memref<4x8x8xf32, #tpu.memory_space<vmem>>, vector<1x8x8xf32>
    %64 = vector.shape_cast %63 : vector<1x8x8xf32> to vector<8x8xf32>
    %cst_69 = arith.constant dense<0.000000e+00> : vector<8x8xf32>
    %65 = tpu.matmul %62, %64, %cst_69 {dimension_numbers = #tpu.dot_dimension_numbers<[1], [0], [0], [1], [0, 0, 1, 1], [], []>} : vector<8x8xf32>, vector<8x8xf32>, vector<8x8xf32> -> vector<8x8xf32>
    %66 = arith.addf %59, %65 : vector<8x8xf32>
    %c0_70 = arith.constant 0 : index
    %c0_71 = arith.constant 0 : index
    %67 = vector.load %arg10[%c0_70, %c0_71] : memref<1x8xf32, #tpu.memory_space<vmem>>, vector<1x8xf32>
    %68 = vector.broadcast %67 : vector<1x8xf32> to vector<8x8xf32>
    %69 = arith.addf %66, %68 : vector<8x8xf32>
    %cst_72 = arith.constant 0.000000e+00 : f32
    %70 = vector.broadcast %cst_72 : f32 to vector<8x8xf32>
    %71 = arith.maximumf %69, %70 : vector<8x8xf32>
    %c0_73 = arith.constant 0 : index
    %c0_74 = arith.constant 0 : index
    %c0_75 = arith.constant 0 : index
    %72 = vector.load %arg11[%c0_73, %c0_74, %c0_75] : memref<4x2x8xf32, #tpu.memory_space<vmem>>, vector<1x2x8xf32>
    %73 = vector.shape_cast %72 : vector<1x2x8xf32> to vector<2x8xf32>
    %cst_76 = arith.constant dense<0.000000e+00> : vector<2x8xf32>
    %74 = tpu.matmul %73, %71, %cst_76 {dimension_numbers = #tpu.dot_dimension_numbers<[1], [0], [0], [1], [0, 0, 1, 1], [], []>} : vector<2x8xf32>, vector<8x8xf32>, vector<2x8xf32> -> vector<2x8xf32>
    %c0_77 = arith.constant 0 : index
    %c0_78 = arith.constant 0 : index
    %c0_79 = arith.constant 0 : index
    %75 = vector.load %arg12[%c0_77, %c0_78, %c0_79] : memref<4x8x32xf32, #tpu.memory_space<vmem>>, vector<1x8x32xf32>
    %76 = vector.shape_cast %75 : vector<1x8x32xf32> to vector<8x32xf32>
    %cst_80 = arith.constant dense<0.000000e+00> : vector<2x32xf32>
    %77 = tpu.matmul %74, %76, %cst_80 {dimension_numbers = #tpu.dot_dimension_numbers<[1], [0], [0], [1], [0, 0, 1, 1], [], []>} : vector<2x8xf32>, vector<8x32xf32>, vector<2x32xf32> -> vector<2x32xf32>
    %c1_81 = arith.constant 1 : index
    %c0_82 = arith.constant 0 : index
    %c0_83 = arith.constant 0 : index
    %78 = vector.load %arg11[%c1_81, %c0_82, %c0_83] : memref<4x2x8xf32, #tpu.memory_space<vmem>>, vector<1x2x8xf32>
    %79 = vector.shape_cast %78 : vector<1x2x8xf32> to vector<2x8xf32>
    %cst_84 = arith.constant dense<0.000000e+00> : vector<2x8xf32>
    %80 = tpu.matmul %79, %71, %cst_84 {dimension_numbers = #tpu.dot_dimension_numbers<[1], [0], [0], [1], [0, 0, 1, 1], [], []>} : vector<2x8xf32>, vector<8x8xf32>, vector<2x8xf32> -> vector<2x8xf32>
    %c1_85 = arith.constant 1 : index
    %c0_86 = arith.constant 0 : index
    %c0_87 = arith.constant 0 : index
    %81 = vector.load %arg12[%c1_85, %c0_86, %c0_87] : memref<4x8x32xf32, #tpu.memory_space<vmem>>, vector<1x8x32xf32>
    %82 = vector.shape_cast %81 : vector<1x8x32xf32> to vector<8x32xf32>
    %cst_88 = arith.constant dense<0.000000e+00> : vector<2x32xf32>
    %83 = tpu.matmul %80, %82, %cst_88 {dimension_numbers = #tpu.dot_dimension_numbers<[1], [0], [0], [1], [0, 0, 1, 1], [], []>} : vector<2x8xf32>, vector<8x32xf32>, vector<2x32xf32> -> vector<2x32xf32>
    %84 = arith.addf %77, %83 : vector<2x32xf32>
    %c2_89 = arith.constant 2 : index
    %c0_90 = arith.constant 0 : index
    %c0_91 = arith.constant 0 : index
    %85 = vector.load %arg11[%c2_89, %c0_90, %c0_91] : memref<4x2x8xf32, #tpu.memory_space<vmem>>, vector<1x2x8xf32>
    %86 = vector.shape_cast %85 : vector<1x2x8xf32> to vector<2x8xf32>
    %cst_92 = arith.constant dense<0.000000e+00> : vector<2x8xf32>
    %87 = tpu.matmul %86, %71, %cst_92 {dimension_numbers = #tpu.dot_dimension_numbers<[1], [0], [0], [1], [0, 0, 1, 1], [], []>} : vector<2x8xf32>, vector<8x8xf32>, vector<2x8xf32> -> vector<2x8xf32>
    %c2_93 = arith.constant 2 : index
    %c0_94 = arith.constant 0 : index
    %c0_95 = arith.constant 0 : index
    %88 = vector.load %arg12[%c2_93, %c0_94, %c0_95] : memref<4x8x32xf32, #tpu.memory_space<vmem>>, vector<1x8x32xf32>
    %89 = vector.shape_cast %88 : vector<1x8x32xf32> to vector<8x32xf32>
    %cst_96 = arith.constant dense<0.000000e+00> : vector<2x32xf32>
    %90 = tpu.matmul %87, %89, %cst_96 {dimension_numbers = #tpu.dot_dimension_numbers<[1], [0], [0], [1], [0, 0, 1, 1], [], []>} : vector<2x8xf32>, vector<8x32xf32>, vector<2x32xf32> -> vector<2x32xf32>
    %91 = arith.addf %84, %90 : vector<2x32xf32>
    %c3_97 = arith.constant 3 : index
    %c0_98 = arith.constant 0 : index
    %c0_99 = arith.constant 0 : index
    %92 = vector.load %arg11[%c3_97, %c0_98, %c0_99] : memref<4x2x8xf32, #tpu.memory_space<vmem>>, vector<1x2x8xf32>
    %93 = vector.shape_cast %92 : vector<1x2x8xf32> to vector<2x8xf32>
    %cst_100 = arith.constant dense<0.000000e+00> : vector<2x8xf32>
    %94 = tpu.matmul %93, %71, %cst_100 {dimension_numbers = #tpu.dot_dimension_numbers<[1], [0], [0], [1], [0, 0, 1, 1], [], []>} : vector<2x8xf32>, vector<8x8xf32>, vector<2x8xf32> -> vector<2x8xf32>
    %c3_101 = arith.constant 3 : index
    %c0_102 = arith.constant 0 : index
    %c0_103 = arith.constant 0 : index
    %95 = vector.load %arg12[%c3_101, %c0_102, %c0_103] : memref<4x8x32xf32, #tpu.memory_space<vmem>>, vector<1x8x32xf32>
    %96 = vector.shape_cast %95 : vector<1x8x32xf32> to vector<8x32xf32>
    %cst_104 = arith.constant dense<0.000000e+00> : vector<2x32xf32>
    %97 = tpu.matmul %94, %96, %cst_104 {dimension_numbers = #tpu.dot_dimension_numbers<[1], [0], [0], [1], [0, 0, 1, 1], [], []>} : vector<2x8xf32>, vector<8x32xf32>, vector<2x32xf32> -> vector<2x32xf32>
    %98 = arith.addf %91, %97 : vector<2x32xf32>
    %c0_105 = arith.constant 0 : index
    %c0_106 = arith.constant 0 : index
    %99 = vector.load %arg13[%c0_105, %c0_106] : memref<1x32xf32, #tpu.memory_space<vmem>>, vector<1x32xf32>
    %100 = vector.broadcast %99 : vector<1x32xf32> to vector<2x32xf32>
    %101 = arith.addf %98, %100 : vector<2x32xf32>
    %cst_107 = arith.constant 0.000000e+00 : f32
    %102 = vector.broadcast %cst_107 : f32 to vector<2x32xf32>
    %103 = arith.maximumf %101, %102 : vector<2x32xf32>
    %c0_108 = arith.constant 0 : index
    %c0_109 = arith.constant 0 : index
    %104 = vector.load %arg14[%c0_108, %c0_109] : memref<32x32xf32, #tpu.memory_space<vmem>>, vector<32x32xf32>
    %cst_110 = arith.constant dense<0.000000e+00> : vector<2x32xf32>
    %105 = tpu.matmul %103, %104, %cst_110 {dimension_numbers = #tpu.dot_dimension_numbers<[1], [0], [0], [1], [0, 0, 1, 1], [], []>} : vector<2x32xf32>, vector<32x32xf32>, vector<2x32xf32> -> vector<2x32xf32>
    %c0_111 = arith.constant 0 : index
    %c0_112 = arith.constant 0 : index
    %106 = vector.load %arg15[%c0_111, %c0_112] : memref<1x32xf32, #tpu.memory_space<vmem>>, vector<1x32xf32>
    %107 = vector.broadcast %106 : vector<1x32xf32> to vector<2x32xf32>
    %108 = arith.addf %105, %107 : vector<2x32xf32>
    %cst_113 = arith.constant 0.000000e+00 : f32
    %109 = vector.broadcast %cst_113 : f32 to vector<2x32xf32>
    %110 = arith.maximumf %108, %109 : vector<2x32xf32>
    %c0_114 = arith.constant 0 : index
    %c0_115 = arith.constant 0 : index
    %111 = vector.load %arg16[%c0_114, %c0_115] : memref<32x8xf32, #tpu.memory_space<vmem>>, vector<32x8xf32>
    %cst_116 = arith.constant dense<0.000000e+00> : vector<2x8xf32>
    %112 = tpu.matmul %110, %111, %cst_116 {dimension_numbers = #tpu.dot_dimension_numbers<[1], [0], [0], [1], [0, 0, 1, 1], [], []>} : vector<2x32xf32>, vector<32x8xf32>, vector<2x8xf32> -> vector<2x8xf32>
    %c0_117 = arith.constant 0 : index
    %c0_118 = arith.constant 0 : index
    %113 = vector.load %arg17[%c0_117, %c0_118] : memref<1x8xf32, #tpu.memory_space<vmem>>, vector<1x8xf32>
    %114 = vector.broadcast %113 : vector<1x8xf32> to vector<2x8xf32>
    %115 = arith.addf %112, %114 : vector<2x8xf32>
    %116 = math.tanh %115 : vector<2x8xf32>
    %c0_119 = arith.constant 0 : index
    %c0_120 = arith.constant 0 : index
    %117 = vector.load %arg18[%c0_119, %c0_120] : memref<8x256xf32, #tpu.memory_space<vmem>>, vector<8x256xf32>
    %cst_121 = arith.constant dense<0.000000e+00> : vector<2x256xf32>
    %118 = tpu.matmul %116, %117, %cst_121 {dimension_numbers = #tpu.dot_dimension_numbers<[1], [0], [0], [1], [0, 0, 1, 1], [], []>} : vector<2x8xf32>, vector<8x256xf32>, vector<2x256xf32> -> vector<2x256xf32>
    %c0_122 = arith.constant 0 : index
    %c0_123 = arith.constant 0 : index
    %119 = vector.load %arg19[%c0_122, %c0_123] : memref<8x256xf32, #tpu.memory_space<vmem>>, vector<8x256xf32>
    %cst_124 = arith.constant dense<0.000000e+00> : vector<2x256xf32>
    %120 = tpu.matmul %116, %119, %cst_124 {dimension_numbers = #tpu.dot_dimension_numbers<[1], [0], [0], [1], [0, 0, 1, 1], [], []>} : vector<2x8xf32>, vector<8x256xf32>, vector<2x256xf32> -> vector<2x256xf32>
    %cst_125 = arith.constant dense<0.000000e+00> : vector<2xf32>
    %121 = vector.multi_reduction <add>, %118, %cst_125 [1] : vector<2x256xf32> to vector<2xf32>
    %122 = vector.shape_cast %121 : vector<2xf32> to vector<2x1xf32>
    %c0_126 = arith.constant 0 : index
    %c0_127 = arith.constant 0 : index
    %123 = memref.load %arg0[%c0_126, %c0_127] : memref<1x1xf32, #tpu.memory_space<smem>>
    %c0_128 = arith.constant 0 : index
    %c0_129 = arith.constant 0 : index
    %124 = vector.load %arg2[%c0_128, %c0_129] : memref<2x256xf32, #tpu.memory_space<vmem>>, vector<2x256xf32>
    %125 = arith.addf %124, %120 : vector<2x256xf32>
    %126 = math.exp %118 : vector<2x256xf32>
    %127 = arith.mulf %125, %126 : vector<2x256xf32>
    %c0_130 = arith.constant 0 : index
    %c0_131 = arith.constant 0 : index
    %128 = vector.load %arg20[%c0_130, %c0_131] : memref<2x256xf32, #tpu.memory_space<vmem>>, vector<2x256xf32>
    tpu.vector_store %arg20[%c0_130, %c0_131], %127 {strides = array<i32>} : memref<2x256xf32, #tpu.memory_space<vmem>>, vector<2x256xf32>,
    %129 = vector.broadcast %123 : f32 to vector<2x1xf32>
    %130 = arith.addf %129, %122 : vector<2x1xf32>
    %c0_132 = arith.constant 0 : index
    %c0_133 = arith.constant 0 : index
    %131 = vector.load %arg21[%c0_132, %c0_133] : memref<2x1xf32, #tpu.memory_space<vmem>>, vector<2x1xf32>
    tpu.vector_store %arg21[%c0_132, %c0_133], %130 {strides = array<i32>} : memref<2x1xf32, #tpu.memory_space<vmem>>, vector<2x1xf32>,
    return
  }
}

</mosaic_0001>

<bundles_post_ra>
// kernel: cond_actnorm_forward.1
= control target key start
LH: loop header
LB: loop body
LE: loop exit
PB: predicated region body
PF: predicated region fallthrough
CT: control target
= control target key end

     0   :  { %vm93_vm0 = vcmask 130048   ;;  %vm485_vm1 = vcmask 64512   ;;  %vm3454_vm2 = vmmov 0   ;;  %vm1082_vm3 = vcmask 261120   ;;  %s4007_s3 = inlined_call_operand.vmem [shape: f32[16,8], index: 3, kind: input, shape index: {}]   ;;  %s4008_s1 = inlined_call_operand.vmem [shape: f32[128,16], index: 1, kind: input, shape index: {}]   ;;  %s4009_s5 = inlined_call_operand.vmem [shape: f32[4,32,128], index: 5, kind: input, shape index: {}]   ;;  %s4010_s4 = inlined_call_operand.vmem [shape: f32[1,8], index: 4, kind: input, shape index: {}]   ;;  %s4011_s6 = inlined_call_operand.vmem [shape: f32[4,8,8], index: 6, kind: input, shape index: {}]   ;;  %s4012_s7 = inlined_call_operand.vmem [shape: f32[1,8], index: 7, kind: input, shape index: {}]   ;;  %s4013_s8 = inlined_call_operand.vmem [shape: f32[4,8,32], index: 8, kind: input, shape index: {}]   ;;  %s4014_s9 = inlined_call_operand.vmem [shape: f32[4,8,8], index: 9, kind: input, shape index: {}]   ;;  %s4015_s10 = inlined_call_operand.vmem [shape: f32[1,8], index: 10, kind: input, shape index: {}]   ;;  %s4016_s11 = inlined_call_operand.vmem [shape: f32[4,2,8], index: 11, kind: input, shape index: {}]   ;;  %s4017_s12 = inlined_call_operand.vmem [shape: f32[4,8,32], index: 12, kind: input, shape index: {}]   ;;  %s4018_s14 = inlined_call_operand.vmem [shape: f32[32,32], index: 14, kind: input, shape index: {}]   ;;  %s4019_s16 = inlined_call_operand.vmem [shape: f32[32,8], index: 16, kind: input, shape index: {}]   ;;  %s4020_s13 = inlined_call_operand.vmem [shape: f32[1,32], index: 13, kind: input, shape index: {}]   ;;  %s4021_s15 = inlined_call_operand.vmem [shape: f32[1,32], index: 15, kind: input, shape index: {}]   ;;  %s4022_s18 = inlined_call_operand.vmem [shape: f32[8,256], index: 18, kind: input, shape index: {}]   ;;  %s4023_s19 = inlined_call_operand.vmem [shape: f32[8,256], index: 19, kind: input, shape index: {}]   ;;  %s4024_s17 = inlined_call_operand.vmem [shape: f32[1,8], index: 17, kind: input, shape index: {}]   ;;  %s4025_s2 = inlined_call_operand.vmem [shape: f32[2,256], index: 2, kind: input, shape index: {}]   ;;  %s4026_s20 = inlined_call_operand.vmem [shape: f32[2,256], index: 20, kind: output, shape index: {0}]   ;;  %s4027_s0 = inlined_call_operand.<no memory space> [shape: f32[1,1], index: 0, kind: input, shape index: {}]   ;;  %s4028_s21 = inlined_call_operand.vmem [shape: f32[2,1], index: 21, kind: output, shape index: {1}]  }
   0x1   :  { %4033 = sst [smem:[#allocation3_spill]] %s4007_s3  ;;  %vm2619_vm4 = vcmask 1041408   ;;  %vm2658_vm5 = vcmask 1024  }
   0x2   :  { %4034 = sst [smem:[#allocation4_spill]] %s4008_s1  ;;  %s4039_s26 = sld [smem:[#allocation3_spill]] }
   0x3   :  { %4035 = sst [smem:[#allocation5_spill]] %s4009_s5  ;;  %s4040_s3 = sld [smem:[#allocation4_spill]] }
   0x4   :  { %4036 = sst [smem:[#allocation6_spill]] %s4010_s4  ;;  %s4041_s23 = sld [smem:[#allocation5_spill]] }
   0x5   :  { %4037 = sst [smem:[#allocation7_spill]] %s4011_s6 }
   0x6   :  { %4038 = sst [smem:[#allocation8_spill]] %s4012_s7  ;;  %s4043_s22 = sld [smem:[#allocation7_spill]] }
   0x7   :  { %s4044_s24 = sld [smem:[#allocation8_spill]] }
   0x8   :  { %v84_v0 = vld [vmem:[%s4039_s26] sm:$0xff]  ;;  %v85_v1 = vld [vmem:[%s4039_s26 + $0x8] sm:$0xff]  ;;  %s4042_s26 = sld [smem:[#allocation6_spill]] }
   0x9   :  { %v68_v2 = vld [vmem:[%s4040_s3] sm:$0xff]  ;;  %v3263_v3 = vpack.c.bf16 %v85_v1, %v84_v0  ;;  %v69_v4 = vld [vmem:[%s4040_s3 + $0x8] sm:$0xff]  ;;  %v70_v5 = vld [vmem:[%s4040_s3 + $0x10] sm:$0xff] }
   0xa   :  { %2929 = vmatprep.mubr.msk.f32.mxu0 %vm93_vm0, %v68_v2  ;;  %v71_v6 = vld [vmem:[%s4040_s3 + $0x18] sm:$0xff]  ;;  %v72_v7 = vld [vmem:[%s4040_s3 + $0x20] sm:$0xff]  ;;  %v73_v8 = vld [vmem:[%s4040_s3 + $0x28] sm:$0xff] }
   0xb   :  { %3264 = vmatprep.subr.bf16.mxu0 %v3263_v3  ;;  %v74_v9 = vld [vmem:[%s4040_s3 + $0x30] sm:$0xff]  ;;  %v75_v10 = vld [vmem:[%s4040_s3 + $0x38] sm:$0xff]  ;;  %v76_v11 = vld [vmem:[%s4040_s3 + $0x40] sm:$0xff] }
   0xc   :  { %3266 = vmatpush3.bf16.msra.mxu0 %v3263_v3  ;;  %v77_v12 = vld [vmem:[%s4040_s3 + $0x48] sm:$0xff]  ;;  %v78_v13 = vld [vmem:[%s4040_s3 + $0x50] sm:$0xff]  ;;  %v79_v14 = vld [vmem:[%s4040_s3 + $0x58] sm:$0xff] }
   0xd   :  { %v80_v15 = vld [vmem:[%s4040_s3 + $0x60] sm:$0xff]  ;;  %v81_v16 = vld [vmem:[%s4040_s3 + $0x68] sm:$0xff]  ;;  %v82_v17 = vld [vmem:[%s4040_s3 + $0x70] sm:$0xff] }
   0xe   :  { %v83_v18 = vld [vmem:[%s4040_s3 + $0x78] sm:$0xff]  ;;  %v2685_v19 = vld [vmem:[%s4041_s23 + $0x20] sm:$0xff] }
   0xf   :  { %2930 = vmatmul.mubr.msk.f32.vlgmr.msra.gmra.mrb[0].mxu0 %vm93_vm0, %v69_v4  ;;  %v303_v20 = vld [vmem:[%s4041_s23] sm:$0xff] }
  0x10   :  { %2932 = vmatprep.mubr.msk.f32.mxu0 %vm93_vm0, %v70_v5  ;;  %2985 = vmatprep.mubr.f32.mxu1 %v303_v20  ;;  %v3646_v21 = vld [vmem:[%s4042_s26] ss:$0 sm:$0xff] }
  0x11   :  { %v2698_v20 = vld [vmem:[%s4041_s23 + $0x40] sm:$0xff] }
  0x13   :  { %2933 = vmatmul.mubr.msk.f32.gmra.mrb[2].mxu0 %vm93_vm0, %v71_v6 }
  0x14   :  { %2935 = vmatprep.mubr.msk.f32.mxu0 %vm93_vm0, %v72_v7 }
  0x17   :  { %2936 = vmatmul.mubr.msk.f32.gmra.mrb[4].mxu0 %vm93_vm0, %v73_v8 }
  0x18   :  { %2938 = vmatprep.mubr.msk.f32.mxu0 %vm93_vm0, %v74_v9 }
  0x1b   :  { %2939 = vmatmul.mubr.msk.f32.gmra.mrb[6].mxu0 %vm93_vm0, %v75_v10 }
  0x1c   :  { %2941 = vmatprep.mubr.msk.f32.mxu0 %vm93_vm0, %v76_v11 }
  0x1f   :  { %2942 = vmatmul.mubr.msk.f32.gmra.mrb[8].mxu0 %vm93_vm0, %v77_v12 }
  0x20   :  { %2944 = vmatprep.mubr.msk.f32.mxu0 %vm93_vm0, %v78_v13 }
  0x23   :  { %2945 = vmatmul.mubr.msk.f32.gmra.mrb[10].mxu0 %vm93_vm0, %v79_v14  ;;  %v2686_v14 = vld [vmem:[%s4041_s23 + $0x28] sm:$0xff] }
  0x24   :  { %2947 = vmatprep.mubr.msk.f32.mxu0 %vm93_vm0, %v80_v15  ;;  %v304_v15 = vld [vmem:[%s4041_s23 + $0x8] sm:$0xff] }
  0x27   :  { %2948 = vmatmul.mubr.msk.f32.gmra.mrb[12].mxu0 %vm93_vm0, %v81_v16  ;;  %v2687_v16 = vld [vmem:[%s4041_s23 + $0x30] sm:$0xff] }
  0x28   :  { %2950 = vmatprep.mubr.msk.f32.mxu0 %vm93_vm0, %v82_v17  ;;  %v305_v17 = vld [vmem:[%s4041_s23 + $0x10] sm:$0xff] }
  0x2b   :  { %2951 = vmatmul.mubr.msk.f32.gmra.mrb[14].mxu0 %vm93_vm0, %v83_v18  ;;  %v2688_v18 = vld [vmem:[%s4041_s23 + $0x38] sm:$0xff] }
  0x2c   :  { %3023 = vmatprep.mubr.f32.mxu0 %v2685_v19  ;;  %v306_v19 = vld [vmem:[%s4041_s23 + $0x18] sm:$0xff] }
  0xe2   :  { %v2931_v22 = vpop.f32.mrb[0].mxu0 }
  0xe3   :  { %v214_v23 = vadd.f32 %v2931_v22, %v3646_v21  ;;  %v208_v24 = vpop.f32.mrb[1].mxu0  ;;  %v2700_v22 = vld [vmem:[%s4041_s23 + $0x50] sm:$0xff] }
  0xe4   :  { %v209_v25 = vadd.f32 %v3646_v21, %v208_v24  ;;  %v2689_v24 = vld [vmem:[%s4043_s22 + $0x8] sm:$0xff] }
  0xe5   :  { %v288_v26 = vmax.f32 %v214_v23, 0.0  ;;  %v2701_v23 = vld [vmem:[%s4041_s23 + $0x58] sm:$0xff] }
  0xe6   :  { %v287_v27 = vmax.f32 %v209_v25, 0.0  ;;  %v2934_v28 = vpop.f32.mrb[2].mxu0  ;;  %v392_v25 = vld [vmem:[%s4043_s22] sm:$0xff] }
  0xe7   :  { %v224_v29 = vadd.f32 %v2934_v28, %v3646_v21  ;;  %v218_v30 = vpop.f32.mrb[3].mxu0 }
  0xe8   :  { %v3651_v31 = vpack.c.bf16 %v288_v26, %v287_v27  ;;  %v219_v32 = vadd.f32 %v3646_v21, %v218_v30  ;;  %v2702_v30 = vld [vmem:[%s4043_s22 + $0x10] sm:$0xff] }
  0xe9   :  { %v290_v33 = vmax.f32 %v224_v29, 0.0 }
  0xea   :  { %v289_v34 = vmax.f32 %v219_v32, 0.0  ;;  %v2937_v35 = vpop.f32.mrb[4].mxu0  ;;  %3268 = vmatprep.subr.bf16.mxu1 %v3651_v31  ;;  %3300 = vmatprep.subr.bf16.mxu0 %v3651_v31 }
  0xeb   :  { %v234_v36 = vadd.f32 %v2937_v35, %v3646_v21  ;;  %v228_v37 = vpop.f32.mrb[5].mxu0  ;;  %3270 = vmatpush3.bf16.msra.mxu1 %v3651_v31  ;;  %3302 = vmatpush3.bf16.msra.mxu0 %v3651_v31 }
  0xec   :  { %v3659_v38 = vpack.c.bf16 %v290_v33, %v289_v34  ;;  %v229_v39 = vadd.f32 %v3646_v21, %v228_v37 }
  0xed   :  { %v292_v40 = vmax.f32 %v234_v36, 0.0 }
  0xee   :  { %v291_v41 = vmax.f32 %v229_v39, 0.0  ;;  %v2940_v42 = vpop.f32.mrb[6].mxu0  ;;  %3272 = vmatprep.subr.bf16.mxu1 %v3659_v38  ;;  %3304 = vmatprep.subr.bf16.mxu0 %v3659_v38 }
  0xef   :  { %v244_v43 = vadd.f32 %v2940_v42, %v3646_v21  ;;  %v238_v44 = vpop.f32.mrb[7].mxu0  ;;  %3274 = vmatpush3.bf16.msra.mxu1 %v3659_v38  ;;  %3306 = vmatpush3.bf16.msra.mxu0 %v3659_v38  ;;  %v2709_v42 = vld [vmem:[%s4041_s23 + $0x70] sm:$0xff] }
  0xf0   :  { %v3667_v45 = vpack.c.bf16 %v292_v40, %v291_v41  ;;  %v239_v46 = vadd.f32 %v3646_v21, %v238_v44  ;;  %v2707_v41 = vld [vmem:[%s4041_s23 + $0x60] sm:$0xff] }
  0xf1   :  { %v294_v47 = vmax.f32 %v244_v43, 0.0  ;;  %v2710_v43 = vld [vmem:[%s4041_s23 + $0x78] sm:$0xff] }
  0xf2   :  { %v293_v48 = vmax.f32 %v239_v46, 0.0  ;;  %v2943_v49 = vpop.f32.mrb[8].mxu0  ;;  %3276 = vmatprep.subr.bf16.mxu1 %v3667_v45  ;;  %3308 = vmatprep.subr.bf16.mxu0 %v3667_v45 }
  0xf3   :  { %v254_v50 = vadd.f32 %v2943_v49, %v3646_v21  ;;  %v248_v51 = vpop.f32.mrb[9].mxu0  ;;  %3278 = vmatpush3.bf16.msra.mxu1 %v3667_v45  ;;  %3310 = vmatpush3.bf16.msra.mxu0 %v3667_v45  ;;  %v3455_v49 = vmov 0.0  }
  0xf4   :  { %v3675_v52 = vpack.c.bf16 %v294_v47, %v293_v48  ;;  %v249_v53 = vadd.f32 %v3646_v21, %v248_v51  ;;  %v3453_v48 = vmov 0.0|0.0  }
  0xf5   :  { %v296_v54 = vmax.f32 %v254_v50, 0.0  ;;  %v2716_v50 = vld [vmem:[%s4044_s24] ss:$0 sm:$0xff] }
  0xf6   :  { %v295_v55 = vmax.f32 %v249_v53, 0.0  ;;  %v2946_v56 = vpop.f32.mrb[10].mxu0  ;;  %3280 = vmatprep.subr.bf16.mxu1 %v3675_v52  ;;  %3312 = vmatprep.subr.bf16.mxu0 %v3675_v52 }
  0xf7   :  { %v264_v57 = vadd.f32 %v2946_v56, %v3646_v21  ;;  %v258_v58 = vpop.f32.mrb[11].mxu0  ;;  %3282 = vmatpush3.bf16.msra.mxu1 %v3675_v52  ;;  %3314 = vmatpush3.bf16.msra.mxu0 %v3675_v52 }
  0xf8   :  { %v3683_v59 = vpack.c.bf16 %v296_v54, %v295_v55  ;;  %v259_v60 = vadd.f32 %v3646_v21, %v258_v58 }
  0xf9   :  { %v298_v61 = vmax.f32 %v264_v57, 0.0 }
  0xfa   :  { %v297_v62 = vmax.f32 %v259_v60, 0.0  ;;  %v2949_v63 = vpop.f32.mrb[12].mxu0  ;;  %3284 = vmatprep.subr.bf16.mxu1 %v3683_v59  ;;  %3316 = vmatprep.subr.bf16.mxu0 %v3683_v59 }
  0xfb   :  { %v274_v0 = vadd.f32 %v2949_v63, %v3646_v21  ;;  %v268_v1 = vpop.f32.mrb[13].mxu0  ;;  %3286 = vmatpush3.bf16.msra.mxu1 %v3683_v59  ;;  %3318 = vmatpush3.bf16.msra.mxu0 %v3683_v59 }
  0xfc   :  { %v3691_v2 = vpack.c.bf16 %v298_v61, %v297_v62  ;;  %v269_v3 = vadd.f32 %v3646_v21, %v268_v1  ;;  %v1081_v1 = vld [vmem:[%s4013_s8] sm:$0xff] }
  0xfd   :  { %v300_v4 = vmax.f32 %v274_v0, 0.0 }
  0xfe   :  { %v299_v5 = vmax.f32 %v269_v3, 0.0  ;;  %v2952_v6 = vpop.f32.mrb[14].mxu0  ;;  %3288 = vmatprep.subr.bf16.mxu1 %v3691_v2  ;;  %3320 = vmatprep.subr.bf16.mxu0 %v3691_v2  ;;  %v2720_v3 = vld [vmem:[%s4014_s9 + $0x8] sm:$0xff] }
  0xff   :  { %v284_v7 = vadd.f32 %v2952_v6, %v3646_v21  ;;  %v278_v8 = vpop.f32.mrb[15].mxu0  ;;  %3290 = vmatpush3.bf16.msra.mxu1 %v3691_v2  ;;  %3322 = vmatpush3.bf16.msra.mxu0 %v3691_v2 }
 0x100   :  { %v3699_v9 = vpack.c.bf16 %v300_v4, %v299_v5  ;;  %v279_v10 = vadd.f32 %v3646_v21, %v278_v8  ;;  %v2699_v21 = vld [vmem:[%s4041_s23 + $0x48] sm:$0xff]  ;;  %v2727_v4 = vld [vmem:[%s4013_s8 + $0x18] sm:$0xff] }
 0x101   :  { %v302_v11 = vmax.f32 %v284_v7, 0.0  ;;  %v1156_v7 = vld [vmem:[%s4014_s9] sm:$0xff] }
 0x102   :  { %v301_v12 = vmax.f32 %v279_v10, 0.0  ;;  %3292 = vmatprep.subr.bf16.mxu1 %v3699_v9  ;;  %3324 = vmatprep.subr.bf16.mxu0 %v3699_v9  ;;  %v2723_v10 = vld [vmem:[%s4013_s8 + $0x10] sm:$0xff] }
 0x103   :  { %3294 = vmatpush3.bf16.msra.mxu1 %v3699_v9  ;;  %3326 = vmatpush3.bf16.msra.mxu0 %v3699_v9 }
 0x104   :  { %v3706_v13 = vpack.c.bf16 %v302_v11, %v301_v12  ;;  %v2725_v11 = vld [vmem:[%s4014_s9 + $0x10] sm:$0xff] }
 0x106   :  { %3296 = vmatprep.subr.bf16.mxu1 %v3706_v13  ;;  %3328 = vmatprep.subr.bf16.mxu0 %v3706_v13 }
 0x107   :  { %3298 = vmatpush3.bf16.msra.mxu1 %v3706_v13  ;;  %3330 = vmatpush3.bf16.msra.mxu0 %v3706_v13 }
 0x108   :  { %3332 = vmatprep.subr.bf16.mxu0 %v3651_v31  ;;  %3029 = vmatprep.subr.mxu1 %v2689_v24 }
 0x10a   :  { %3024 = vmatmul.mubr.f32.vlgmr.msra.gmra.mrb[16].mxu0 %v2686_v14  ;;  %2986 = vmatmul.mubr.f32.vlgmr.msra.gmra.mrb[0].mxu1 %v304_v15 }
 0x10b   :  { %3334 = vmatpush3.bf16.msra.mxu0 %v3651_v31  ;;  %3026 = vmatprep.mubr.f32.mxu0 %v2687_v16 }
 0x10c   :  { %3336 = vmatprep.subr.bf16.mxu0 %v3659_v38  ;;  %2988 = vmatprep.mubr.f32.mxu1 %v305_v17 }
 0x10d   :  { %3030 = vmatpush3.msra.mxu1 %v2689_v24 }
 0x10e   :  { %3027 = vmatmul.mubr.f32.gmra.mrb[18].mxu0 %v2688_v18  ;;  %2989 = vmatmul.mubr.f32.gmra.mrb[2].mxu1 %v306_v19  ;;  %v2729_v19 = vld [vmem:[%s4014_s9 + $0x18] sm:$0xff] }
 0x10f   :  { %3338 = vmatpush3.bf16.msra.mxu0 %v3659_v38  ;;  %3077 = vmatprep.mubr.f32.mxu0 %v2698_v20 }
 0x110   :  { %3340 = vmatprep.subr.bf16.mxu0 %v3667_v45  ;;  %3037 = vmatprep.subr.mxu1 %v392_v25 }
 0x113   :  { %3342 = vmatpush3.bf16.msra.mxu0 %v3667_v45 }
 0x114   :  { %3344 = vmatprep.subr.bf16.mxu0 %v3675_v52 }
 0x117   :  { %3346 = vmatpush3.bf16.msra.mxu0 %v3675_v52 }
 0x118   :  { %3348 = vmatprep.subr.bf16.mxu0 %v3683_v59 }
 0x11b   :  { %3350 = vmatpush3.bf16.msra.mxu0 %v3683_v59 }
 0x11c   :  { %3352 = vmatprep.subr.bf16.mxu0 %v3691_v2 }
 0x11f   :  { %3354 = vmatpush3.bf16.msra.mxu0 %v3691_v2 }
 0x120   :  { %3356 = vmatprep.subr.bf16.mxu0 %v3699_v9 }
 0x123   :  { %3358 = vmatpush3.bf16.msra.mxu0 %v3699_v9 }
 0x124   :  { %3360 = vmatprep.subr.bf16.mxu0 %v3706_v13 }
 0x127   :  { %3362 = vmatpush3.bf16.msra.mxu0 %v3706_v13 }
 0x128   :  { %3395 = vmatprep.subr.bf16.mxu0 %v3453_v48 }
 0x12a   :  { %3078 = vmatmul.mubr.f32.vlgmr.msra.gmra.mrb[20].mxu0 %v2699_v21 }
 0x12b   :  { %3080 = vmatprep.mubr.f32.mxu0 %v2700_v22 }
 0x12e   :  { %3081 = vmatmul.mubr.f32.gmra.mrb[22].mxu0 %v2701_v23 }
 0x12f   :  { %3145 = vmatprep.mubr.msk.f32.mxu0 %vm3454_vm2, %v3455_v49 }
 0x1dd   :  { %v3025_v26 = vpop.f32.mrb[16].mxu0  ;;  %v2987_v27 = vpop.f32.mrb[0].mxu1 }
 0x1de   :  { %v464_v28 = vpop.f32.mrb[17].mxu0  ;;  %v373_v29 = vpop.f32.mrb[1].mxu1 }
 0x1df   :  { %3031 = vmatprep.mubr.msk.f32.mxu1 %vm485_vm1, %v464_v28 }
 0x1e0   :  { %3032 = vmatmul.mubr.msk.f32.vlgmr.msra.gmra.mrb[4].mxu1 %vm485_vm1, %v3025_v26  ;;  %v2731_v26 = vld [vmem:[%s4015_s10] ss:$0 sm:$0xff] }
 0x1e1   :  { %v3028_v32 = vpop.f32.mrb[18].mxu0  ;;  %3038 = vmatpush3.msra.mxu1 %v392_v25  ;;  %v2990_v33 = vpop.f32.mrb[2].mxu1 }
 0x1e2   :  { %v474_v34 = vpop.f32.mrb[19].mxu0  ;;  %3083 = vmatprep.subr.mxu1 %v2702_v30  ;;  %v383_v35 = vpop.f32.mrb[3].mxu1 }
 0x1e3   :  { %3034 = vmatprep.mubr.msk.f32.mxu1 %vm485_vm1, %v474_v34  ;;  %v2735_v34 = vld [vmem:[%s4017_s12 + $0x8] sm:$0xff] }
 0x1e4   :  { %3035 = vmatmul.mubr.msk.f32.gmra.mrb[6].mxu1 %vm485_vm1, %v3028_v32  ;;  %v2733_v32 = vld [vmem:[%s4016_s11 + $0x2] sm:$0x3] }
 0x1e5   :  { %3039 = vmatprep.mubr.msk.f32.mxu1 %vm485_vm1, %v373_v29 }
 0x1e8   :  { %3040 = vmatmul.mubr.msk.f32.vlgmr.msra.gmra.mrb[4].mxu1 %vm485_vm1, %v2987_v27 }
 0x1e9   :  { %3084 = vmatpush3.msra.mxu1 %v2702_v30  ;;  %3042 = vmatprep.mubr.msk.f32.mxu1 %vm485_vm1, %v383_v35  ;;  %v1765_v35 = vld [vmem:[%s4017_s12] sm:$0xff] }
 0x1ea   :  { %3364 = vmatprep.subr.bf16.mxu1 %v3651_v31 }
 0x1ec   :  { %3043 = vmatmul.mubr.msk.f32.gmra.mrb[6].mxu1 %vm485_vm1, %v2990_v33  ;;  %v1691_v33 = vld [vmem:[%s4016_s11] sm:$0x3] }
 0x1fd   :  { %v3079_v36 = vpop.f32.mrb[20].mxu0 }
 0x1fe   :  { %v751_v37 = vpop.f32.mrb[21].mxu0 }
 0x1ff   :  { %3085 = vmatprep.mubr.msk.f32.mxu1 %vm485_vm1, %v751_v37 }
 0x200   :  { %3086 = vmatmul.mubr.msk.f32.vlgmr.msra.gmra.mrb[4].mxu1 %vm485_vm1, %v3079_v36 }
 0x201   :  { %3366 = vmatpush3.bf16.msra.mxu1 %v3651_v31  ;;  %v3082_v39 = vpop.f32.mrb[22].mxu0  ;;  %v2711_v31 = vld [vmem:[%s4043_s22 + $0x18] sm:$0xff] }
 0x202   :  { %3368 = vmatprep.subr.bf16.mxu1 %v3659_v38  ;;  %v761_v40 = vpop.f32.mrb[23].mxu0 }
 0x203   :  { %3088 = vmatprep.mubr.msk.f32.mxu1 %vm485_vm1, %v761_v40 }
 0x204   :  { %3089 = vmatmul.mubr.msk.f32.gmra.mrb[6].mxu1 %vm485_vm1, %v3082_v39 }
 0x205   :  { %3370 = vmatpush3.bf16.msra.mxu1 %v3659_v38  ;;  %3123 = vmatprep.mubr.f32.mxu1 %v2707_v41  ;;  %v2708_v38 = vld [vmem:[%s4041_s23 + $0x68] sm:$0xff]  ;;  %v2738_v41 = vld [vmem:[%s4016_s11 + $0x4] sm:$0x3] }
 0x206   :  { %3372 = vmatprep.subr.bf16.mxu1 %v3667_v45 }
 0x209   :  { %3374 = vmatpush3.bf16.msra.mxu1 %v3667_v45 }
 0x20a   :  { %3376 = vmatprep.subr.bf16.mxu1 %v3675_v52 }
 0x20d   :  { %3378 = vmatpush3.bf16.msra.mxu1 %v3675_v52 }
 0x20e   :  { %3380 = vmatprep.subr.bf16.mxu1 %v3683_v59 }
 0x211   :  { %3382 = vmatpush3.bf16.msra.mxu1 %v3683_v59 }
 0x212   :  { %3384 = vmatprep.subr.bf16.mxu1 %v3691_v2 }
 0x215   :  { %3386 = vmatpush3.bf16.msra.mxu1 %v3691_v2  ;;  %v2718_v2 = vld [vmem:[%s4013_s8 + $0x8] sm:$0xff] }
 0x216   :  { %3388 = vmatprep.subr.bf16.mxu1 %v3699_v9 }
 0x219   :  { %3390 = vmatpush3.bf16.msra.mxu1 %v3699_v9 }
 0x21a   :  { %3392 = vmatprep.subr.bf16.mxu1 %v3706_v13 }
 0x21d   :  { %3394 = vmatpush3.bf16.msra.mxu1 %v3706_v13 }
 0x21e   :  { %3129 = vmatprep.subr.mxu1 %v2711_v31 }
 0x220   :  { %3124 = vmatmul.mubr.f32.vlgmr.msra.gmra.mrb[8].mxu1 %v2708_v38  ;;  %v2740_v38 = vld [vmem:[%s4017_s12 + $0x10] sm:$0xff] }
 0x221   :  { %3126 = vmatprep.mubr.f32.mxu1 %v2709_v42  ;;  %3130 = vmatpush3.msra.mxu1 %v2711_v31  ;;  %v2742_v31 = vld [vmem:[%s4016_s11 + $0x6] sm:$0x3] }
 0x222   :  { %3413 = vmatprep.subr.bf16.mxu1 %v3453_v48 }
 0x224   :  { %3127 = vmatmul.mubr.f32.gmra.mrb[10].mxu1 %v2710_v43 }
 0x2f3   :  { %v3125_v44 = vpop.f32.mrb[8].mxu1 }
 0x2f4   :  { %v944_v45 = vpop.f32.mrb[9].mxu1 }
 0x2f5   :  { %3131 = vmatprep.mubr.msk.f32.mxu1 %vm485_vm1, %v944_v45 }
 0x2f6   :  { %3132 = vmatmul.mubr.msk.f32.vlgmr.msra.gmra.mrb[4].mxu1 %vm485_vm1, %v3125_v44 }
 0x2f7   :  { %v3128_v46 = vpop.f32.mrb[10].mxu1 }
 0x2f8   :  { %v954_v47 = vpop.f32.mrb[11].mxu1 }
 0x2f9   :  { %3134 = vmatprep.mubr.msk.f32.mxu1 %vm485_vm1, %v954_v47  ;;  %v2744_v47 = vld [vmem:[%s4017_s12 + $0x18] sm:$0xff] }
 0x2fa   :  { %3135 = vmatmul.mubr.msk.f32.gmra.mrb[6].mxu1 %vm485_vm1, %v3128_v46 }
 0x2fb   :  { %3193 = vmatprep.mubr.msk.f32.mxu1 %vm3454_vm2, %v3455_v49 }
 0x3c9   :  { %v3133_v51 = vpop.f32.mrb[4].mxu1 }
 0x3ca   :  { %v1074_v52 = vadd.f32 %v3133_v51, %v2716_v50  ;;  %v1043_v53 = vpop.f32.mrb[5].mxu1 }
 0x3cb   :  { %v1073_v54 = vadd.f32 %v2716_v50, %v1043_v53 }
 0x3cc   :  { %v1078_v55 = vmax.f32 %v1074_v52, 0.0 }
 0x3cd   :  { %v1077_v56 = vmax.f32 %v1073_v54, 0.0  ;;  %v3136_v57 = vpop.f32.mrb[6].mxu1  ;;  %v2300_v54 = vld [vmem:[%s4018_s14] sm:$0xff] }
 0x3ce   :  { %v1076_v58 = vadd.f32 %v3136_v57, %v2716_v50  ;;  %v1053_v59 = vpop.f32.mrb[7].mxu1  ;;  %v2302_v57 = vld [vmem:[%s4018_s14 + $0x10] sm:$0xff] }
 0x3cf   :  { %v3396_v60 = vpack.c.bf16 %v1078_v55, %v1077_v56  ;;  %v1075_v61 = vadd.f32 %v2716_v50, %v1053_v59  ;;  %v2301_v55 = vld [vmem:[%s4018_s14 + $0x8] sm:$0xff] }
 0x3d0   :  { %v1080_v62 = vmax.f32 %v1076_v58, 0.0  ;;  %v3420_v56 = vpack.c.bf16 %v2301_v55, %v2300_v54  ;;  %v2303_v58 = vld [vmem:[%s4018_s14 + $0x18] sm:$0xff] }
 0x3d1   :  { %v1079_v63 = vmax.f32 %v1075_v61, 0.0  ;;  %3397 = vmatpush3.bf16.msra.mxu0 %v3396_v60  ;;  %3415 = vmatpush3.bf16.msra.mxu1 %v3396_v60  ;;  %v3423_v59 = vpack.c.bf16 %v2303_v58, %v2302_v57  ;;  %v2386_v61 = vld [vmem:[%s4019_s16 + $0x8] sm:$0xff] }
 0x3d2   :  { %3398 = vmatprep.subr.bf16.mxu0 %v3453_v48  ;;  %3416 = vmatprep.subr.bf16.mxu1 %v3453_v48 }
 0x3d3   :  { %v3399_v0 = vpack.c.bf16 %v1080_v62, %v1079_v63 }
 0x3d5   :  { %3400 = vmatpush3.bf16.msra.mxu0 %v3399_v0  ;;  %3418 = vmatpush3.bf16.msra.mxu1 %v3399_v0 }
 0x3d6   :  { %3401 = vmatprep.subr.bf16.mxu0 %v3453_v48  ;;  %3201 = vmatprep.subr.mxu1 %v3455_v49 }
 0x3d8   :  { %3146 = vmatmul.mubr.msk.f32.vlgmr.msra.gmra.mrb[24].mxu0 %vm1082_vm3, %v1081_v1  ;;  %3194 = vmatmul.mubr.msk.f32.vlgmr.msra.gmra.mrb[12].mxu1 %vm1082_vm3, %v2727_v4 }
 0x3d9   :  { %3403 = vmatpush3.bf16.msra.mxu0 %v3396_v60  ;;  %3156 = vmatprep.mubr.msk.f32.mxu0 %vm3454_vm2, %v3455_v49 }
 0x3da   :  { %3404 = vmatprep.subr.bf16.mxu0 %v3453_v48  ;;  %3203 = vmatprep.mubr.msk.f32.mxu1 %vm3454_vm2, %v3455_v49 }
 0x3dd   :  { %3406 = vmatpush3.bf16.msra.mxu0 %v3399_v0 }
 0x3de   :  { %3159 = vmatprep.subr.mxu0 %v3455_v49 }
 0x3e0   :  { %3157 = vmatmul.mubr.msk.f32.vlgmr.msra.gmra.mrb[26].mxu0 %vm1082_vm3, %v2718_v2 }
 0x3e1   :  { %3161 = vmatprep.mubr.msk.f32.mxu0 %vm3454_vm2, %v3455_v49  ;;  %3160 = vmatpush3.msra.mxu0 %v2720_v3  ;;  %v2746_v3 = vld [vmem:[%s4020_s13] ss:$0 sm:$0xff] }
 0x3e2   :  { %3164 = vmatprep.subr.mxu0 %v3455_v49 }
 0x4ab   :  { %v1152_v5 = vpop.f32.mrb[24].mxu0  ;;  %v1602_v12 = vpop.f32.mrb[12].mxu1 }
 0x4ac   :  { %v3147_v6 = vpop.f32.mrb[25].mxu0  ;;  %v3195_v13 = vpop.f32.mrb[13].mxu1 }
 0x4b3   :  { %v1228_v8 = vpop.f32.mrb[26].mxu0 }
 0x4b4   :  { %v3158_v9 = vpop.f32.mrb[27].mxu0  ;;  %3162 = vmatmul.mubr.msk.f32.vlgmr.msra.gmra.mrb[28].mxu0 %vm485_vm1, %v1228_v8  ;;  %v2388_v8 = vld [vmem:[%s4019_s16 + $0x18] sm:$0xff] }
 0x4b5   :  { %3165 = vmatpush3.msra.mxu0 %v1156_v7  ;;  %3166 = vmatprep.mubr.msk.f32.mxu0 %vm3454_vm2, %v3455_v49 }
 0x4b6   :  { %3407 = vmatprep.subr.bf16.mxu0 %v3453_v48 }
 0x4b8   :  { %3167 = vmatmul.mubr.msk.f32.vlgmr.msra.gmra.mrb[30].mxu0 %vm485_vm1, %v1152_v5 }
 0x4b9   :  { %3409 = vmatpush3.bf16.msra.mxu0 %v3396_v60  ;;  %3177 = vmatprep.mubr.msk.f32.mxu0 %vm3454_vm2, %v3455_v49  ;;  %v2385_v60 = vld [vmem:[%s4019_s16] sm:$0xff] }
 0x4ba   :  { %3410 = vmatprep.subr.bf16.mxu0 %v3453_v48  ;;  %v3426_v62 = vpack.c.bf16 %v2386_v61, %v2385_v60 }
 0x4bd   :  { %3412 = vmatpush3.bf16.msra.mxu0 %v3399_v0 }
 0x4be   :  { %3180 = vmatprep.subr.mxu0 %v3455_v49 }
 0x4c0   :  { %3178 = vmatmul.mubr.msk.f32.vlgmr.msra.gmra.mrb[32].mxu0 %vm1082_vm3, %v2723_v10  ;;  %v2747_v10 = vld [vmem:[%s4021_s15] ss:$0 sm:$0xff] }
 0x4c1   :  { %3182 = vmatprep.mubr.msk.f32.mxu0 %vm3454_vm2, %v3455_v49  ;;  %3181 = vmatpush3.msra.mxu0 %v2725_v11 }
 0x4c2   :  { %3196 = vmatprep.subr.mxu0 %v3455_v49 }
 0x587   :  { %v1303_v14 = vpop.f32.mrb[28].mxu0 }
 0x588   :  { %v3163_v15 = vpop.f32.mrb[29].mxu0 }
 0x589   :  { %v2471_v15 = vld [vmem:[%s4022_s18 + $0x8] sm:$0xff] }
 0x58b   :  { %v1376_v16 = vpop.f32.mrb[30].mxu0 }
 0x58c   :  { %v1377_v17 = vadd.f32 %v1376_v16, %v1303_v14  ;;  %v3168_v18 = vpop.f32.mrb[31].mxu0  ;;  %v2547_v16 = vld [vmem:[%s4023_s19 + $0x8] sm:$0xff] }
 0x58d   :  { %v2546_v18 = vld [vmem:[%s4023_s19] sm:$0xff] }
 0x593   :  { %v1451_v20 = vpop.f32.mrb[32].mxu0 }
 0x594   :  { %v3179_v21 = vpop.f32.mrb[33].mxu0  ;;  %3183 = vmatmul.mubr.msk.f32.vlgmr.msra.gmra.mrb[34].mxu0 %vm485_vm1, %v1451_v20 }
 0x595   :  { %3197 = vmatpush3.msra.mxu0 %v2729_v19  ;;  %3198 = vmatprep.mubr.msk.f32.mxu0 %vm3454_vm2, %v3455_v49 }
 0x596   :  { %3206 = vmatprep.subr.mxu0 %v3455_v49 }
 0x598   :  { %3199 = vmatmul.mubr.msk.f32.vlgmr.msra.gmra.mrb[36].mxu0 %vm485_vm1, %v1602_v12 }
 0x599   :  { %3208 = vmatprep.mubr.msk.f32.mxu0 %vm3454_vm2, %v3455_v49 }
 0x667   :  { %v1526_v22 = vpop.f32.mrb[34].mxu0 }
 0x668   :  { %v1530_v23 = vadd.f32 %v1526_v22, %v1377_v17  ;;  %v3184_v24 = vpop.f32.mrb[35].mxu0  ;;  %v2470_v17 = vld [vmem:[%s4022_s18] sm:$0xff] }
 0x66b   :  { %v1677_v25 = vpop.f32.mrb[36].mxu0 }
 0x66c   :  { %v1681_v27 = vadd.f32 %v1677_v25, %v1530_v23  ;;  %v3200_v28 = vpop.f32.mrb[37].mxu0 }
 0x66d   :  { %v3456_v28 = vmov 1983009808  }
 0x66e   :  { %v1689_v29 = vadd.f32 %v2731_v26, %v1681_v27 }
 0x670   :  { %v1690_v30 = vmax.f32 %v1689_v29, 0.0  ;;  %v2631_v29 = vunpack.c.l.s4 %v3456_v28 }
 0x672   :  { %3202 = vmatpush3.msra.mxu1 %v1690_v30  ;;  %3207 = vmatpush3.msra.mxu0 %v1690_v30 }
 0x673   :  { %3209 = vmatmul.mubr.msk.f32.vlgmr.msra.gmra.mrb[38].mxu0 %vm485_vm1, %v2733_v32  ;;  %3204 = vmatmul.mubr.msk.f32.vlgmr.msra.gmra.mrb[14].mxu1 %vm485_vm1, %v1691_v33 }
 0x674   :  { %3211 = vmatprep.subr.mxu1 %v3455_v49  ;;  %3213 = vmatprep.mubr.msk.f32.mxu1 %vm3454_vm2, %v3455_v49 }
 0x675   :  { %3212 = vmatpush3.msra.mxu1 %v2735_v34  ;;  %3216 = vmatprep.subr.mxu0 %v3455_v49 }
 0x676   :  { %3221 = vmatprep.subr.mxu1 %v3455_v49  ;;  %3218 = vmatprep.mubr.msk.f32.mxu0 %vm3454_vm2, %v3455_v49 }
 0x677   :  { %3217 = vmatpush3.msra.mxu0 %v1765_v35 }
 0x678   :  { %3226 = vmatprep.subr.mxu0 %v3455_v49 }
 0x746   :  { %v1837_v36 = vpop.f32.mrb[38].mxu0  ;;  %v1761_v37 = vpop.f32.mrb[14].mxu1 }
 0x747   :  { %3214 = vmatmul.mubr.msk.f32.vlgmr.msra.gmra.mrb[16].mxu1 %vm485_vm1, %v1837_v36  ;;  %v3210_v39 = vpop.f32.mrb[39].mxu0  ;;  %3219 = vmatmul.mubr.msk.f32.vlgmr.msra.gmra.mrb[40].mxu0 %vm485_vm1, %v1761_v37  ;;  %v3205_v40 = vpop.f32.mrb[15].mxu1  ;;  %v2632_v37 = vunpack.c.0.s8 %v2631_v29 }
 0x748   :  { %3222 = vmatpush3.msra.mxu1 %v1690_v30  ;;  %3223 = vmatprep.mubr.msk.f32.mxu1 %vm3454_vm2, %v3455_v49 }
 0x749   :  { %3231 = vmatprep.subr.mxu1 %v3455_v49  ;;  %3228 = vmatprep.mubr.msk.f32.mxu0 %vm3454_vm2, %v3455_v49 }
 0x74a   :  { %3227 = vmatpush3.msra.mxu0 %v2740_v38 }
 0x74b   :  { %3224 = vmatmul.mubr.msk.f32.vlgmr.msra.gmra.mrb[18].mxu1 %vm485_vm1, %v2738_v41  ;;  %3236 = vmatprep.subr.mxu0 %v3455_v49 }
 0x74c   :  { %3232 = vmatpush3.msra.mxu1 %v1690_v30  ;;  %3233 = vmatprep.mubr.msk.f32.mxu1 %vm3454_vm2, %v3455_v49  ;;  %v2633_v30 = vlaneseq }
 0x74d   :  { %3419 = vmatprep.subr.bf16.mxu1 %v3453_v48 }
 0x74e   :  { %v2634_v39 = vshrl.u32 %v2633_v30, 7 }
 0x74f   :  { %3234 = vmatmul.mubr.msk.f32.vlgmr.msra.gmra.mrb[20].mxu1 %vm485_vm1, %v2742_v31 }
 0x750   :  { %3249 = vmatprep.mubr.msk.f32.mxu1 %vm3454_vm2, %v3455_v49  ;;  %3421 = vmatpush3.bf16.msra.mxu1 %v3420_v56  ;;  %v2635_v40 = vsub.s32 %v2632_v37, %v2634_v39 }
 0x751   :  { %3422 = vmatprep.subr.bf16.mxu1 %v3453_v48 }
 0x754   :  { %3424 = vmatpush3.bf16.msra.mxu1 %v3423_v59 }
 0x755   :  { %2475 = vmatprep.subr.mxu1 %v2471_v15 }
 0x81a   :  { %v1912_v42 = vpop.f32.mrb[16].mxu1  ;;  %v1985_v43 = vpop.f32.mrb[40].mxu0 }
 0x81b   :  { %v3215_v44 = vpop.f32.mrb[17].mxu1  ;;  %v1986_v45 = vadd.f32 %v1985_v43, %v1912_v42  ;;  %v3220_v46 = vpop.f32.mrb[41].mxu0  ;;  %v2626_v42 = vld [vmem:[%s4025_s2] sm:$0xf] }
 0x81e   :  { %v2060_v50 = vpop.f32.mrb[18].mxu1 }
 0x81f   :  { %3229 = vmatmul.mubr.msk.f32.vlgmr.msra.gmra.mrb[42].mxu0 %vm485_vm1, %v2060_v50  ;;  %v3225_v51 = vpop.f32.mrb[19].mxu1 }
 0x820   :  { %3237 = vmatpush3.msra.mxu0 %v2744_v47  ;;  %3238 = vmatprep.mubr.msk.f32.mxu0 %vm3454_vm2, %v3455_v49  ;;  %v2656_v47 = vstv %s4027_s0 }
 0x821   :  { %3425 = vmatprep.subr.bf16.mxu0 %v3453_v48 }
 0x822   :  { %v2211_v52 = vpop.f32.mrb[20].mxu1 }
 0x823   :  { %3239 = vmatmul.mubr.msk.f32.vlgmr.msra.gmra.mrb[44].mxu0 %vm485_vm1, %v2211_v52  ;;  %v3235_v53 = vpop.f32.mrb[21].mxu1 }
 0x824   :  { %3260 = vmatprep.mubr.msk.f32.mxu0 %vm3454_vm2, %v3455_v49  ;;  %3427 = vmatpush3.bf16.msra.mxu0 %v3426_v62 }
 0x825   :  { %3428 = vmatprep.subr.bf16.mxu0 %v3453_v48  ;;  %v2387_v48 = vld [vmem:[%s4019_s16 + $0x10] sm:$0xff] }
 0x826   :  { %v3429_v9 = vpack.c.bf16 %v2388_v8, %v2387_v48 }
 0x828   :  { %3430 = vmatpush3.bf16.msra.mxu0 %v3429_v9 }
 0x829   :  { %2548 = vmatprep.subr.mxu0 %v2547_v16 }
 0x8f2   :  { %v2135_v63 = vpop.f32.mrb[42].mxu0 }
 0x8f3   :  { %v2139_v0 = vadd.f32 %v2135_v63, %v1986_v45  ;;  %v3230_v1 = vpop.f32.mrb[43].mxu0 }
 0x8f6   :  { %v2286_v2 = vpop.f32.mrb[44].mxu0 }
 0x8f7   :  { %v2290_v4 = vadd.f32 %v2286_v2, %v2139_v0  ;;  %v3240_v5 = vpop.f32.mrb[45].mxu0 }
 0x8f9   :  { %v2298_v6 = vadd.f32 %v2746_v3, %v2290_v4 }
 0x8fb   :  { %v2299_v7 = vmax.f32 %v2298_v6, 0.0 }
 0x8fd   :  { %3250 = vmatmul.mubr.msk.f32.vlgmr.msra.gmra.mrb[22].mxu1 %vm1082_vm3, %v2299_v7 }
 0x8fe   :  { %2539 = vmatprep.mubr.f32.mxu1 %v3455_v49  ;;  %2476 = vmatpush1.msra.mxu1 %v2470_v17 }
 0x9d0   :  { %v2380_v11 = vpop.f32.mrb[22].mxu1 }
 0x9d1   :  { %v2381_v12 = vadd.f32 %v2747_v10, %v2380_v11  ;;  %v3251_v13 = vpop.f32.mrb[23].mxu1 }
 0x9d3   :  { %v2384_v14 = vmax.f32 %v2381_v12, 0.0 }
 0x9d5   :  { %3261 = vmatmul.mubr.msk.f32.vlgmr.msra.gmra.mrb[46].mxu0 %vm1082_vm3, %v2384_v14 }
 0x9d6   :  { %2612 = vmatprep.mubr.f32.mxu0 %v3455_v49  ;;  %2549 = vmatpush1.msra.mxu0 %v2546_v18  ;;  %v2749_v49 = vld [vmem:[%s4024_s17] ss:$0 sm:$0xff] }
 0xaa8   :  { %v2465_v19 = vpop.f32.mrb[46].mxu0 }
 0xaa9   :  { %v2466_v20 = vadd.f32 %v2749_v49, %v2465_v19  ;;  %v3262_v21 = vpop.f32.mrb[47].mxu0 }
 0xaab   :  { %3447 = vtanh.f32 %v2466_v20 }
 0xab5   :  { %v3448_v22 = vpop.eup %3447 }
 0xab6   :  { %2751 = vmatmul.mubr.msk.f32.vlgmr.msra.gmra.mrb[24].mxu1 %vm485_vm1, %v3448_v22  ;;  %2752 = vmatmul.mubr.msk.f32.vlgmr.msra.gmra.mrb[48].mxu0 %vm485_vm1, %v3448_v22 }
 0xb89   :  { %v2541_v23 = vpop.f32.mrb[24].mxu1  ;;  %v2614_v24 = vpop.f32.mrb[48].mxu0 }
 0xb8a   :  { %v2639_v25 = vmul.f32 1.442695, %v2541_v23  ;;  %v2543_v26 = vpop.f32.mrb[25].mxu1  ;;  %v2616_v27 = vpop.f32.mrb[49].mxu0  ;;  %v2620_v32 = vsel %vm2619_vm4, %v2541_v23, 0.0 }
 0xb8b   :  { %v2621_v33 = vsel %vm2619_vm4, %v2543_v26, 0.0  ;;  %v2641_v34 = vmul.f32 1.442695, %v2543_v26  ;;  %v2629_v35 = vcombine.low %v2614_v24, %v2616_v27 }
 0xb8c   :  { %3449 = vpow2.f32 %v2639_v25  ;;  %v2622_v36 = vadd.f32 %v2621_v33, %v2620_v32 }
 0xb8d   :  { %3451 = vpow2.f32 %v2641_v34  ;;  %v2636_v31 = vrot.slane %v2629_v35, %v2635_v40 }
 0xb8e   :  { %2623 = vadd.xlane.f32.xlu0 %v2622_v36 }
 0xb8f   :  { %v2638_v44 = vadd.f32 %v2636_v31, %v2626_v42 }
 0xb96   :  { %v3450_v41 = vpop.eup %3449 }
 0xb97   :  { %v3452_v38 = vpop.eup %3451 }
 0xb98   :  { %v2645_v43 = vcombine.low %v3450_v41, %v3452_v38 }
 0xb9a   :  { %v2652_v45 = vrot.slane %v2645_v43, %v2635_v40 }
 0xb9c   :  { %v2654_v46 = vmul.f32 %v2652_v45, %v2638_v44 }
 0xb9e   :  { %2655 = vst [vmem:[%s4026_s20] sm:$0xf] %v2654_v46 }
 0xc1b   :  { %v2624_v50 = vpop.xlane.xlu0 %2623 }
 0xc1c   :  { %v2657_v51 = vadd.f32 %v2656_v47, %v2624_v50 }
 0xc1e   :  { %2659 = vst.msk [vmem:[%s4028_s21] sm:$0x3] %vm2658_vm5, %v2657_v51 }

</bundles_post_ra>
